<compile_context>
chip_gen: v7x
topology: tpu7x:2x2x1
jax: 0.10.0
libtpu: 0.0.40
codegen_flags: <defaults>
</compile_context>

<pallas_src>
import functools

import jax
import jax.numpy as jnp
from jax import lax
from jax.experimental import pallas as pl
from jax.experimental.pallas import tpu as pltpu

# ----------------------------- config (small) -----------------------------
BATCH = 2
NUM_PATCHES = 16          # sequence length
HIDDEN = 32               # embed dim
NUM_HEADS = 4
HEAD_DIM = HIDDEN // NUM_HEADS
INTERMEDIATE = 64
LN_EPS = 1e-6
SCALE = HEAD_DIM ** (-0.5)


def _gelu_tanh(x):
    # PyTorch nn.functional.gelu(x, approximate='tanh')
    c = jnp.sqrt(2.0 / jnp.pi).astype(x.dtype)
    return 0.5 * x * (1.0 + jnp.tanh(c * (x + 0.044715 * x * x * x)))


def _normalize(x, eps):
    # LayerNorm without affine (gamma/beta folded into downstream weights).
    mu = jnp.mean(x, axis=-1, keepdims=True)
    var = jnp.mean((x - mu) ** 2, axis=-1, keepdims=True)
    return (x - mu) * lax.rsqrt(var + eps)


def encoder_layer_kernel(x_ref, wqv_ref, wo_ref, w1_ref, w2_ref, pv_ref,
                         out_ref, *, num_heads, head_dim, eps):
    n, d = x_ref.shape                       # n = tokens of this sequence
    i_dim = w1_ref.shape[1]

    x = x_ref[...]                           # (n, d) float32
    pv = pv_ref[...]                         # (4, max(2d, I)) packed vectors

    bqv = pv[0:1, :2 * d]                    # fused q/v bias (LN1 + scale folded)
    b1 = pv[1:2, :i_dim]                     # fc1 bias (LN2 folded)
    bo = pv[2:3, :d]                         # out_proj bias
    b2 = pv[3:4, :d]                         # fc2 bias

    # ---- layer_norm1 (affine folded into wqv/bqv) ----
    h = _normalize(x, eps)

    # ---- fused Q/V projection.  K = q_proj(h) (reference bug), and
    #      sqrt(scale) is folded into the q-columns, so q == k here.
    qv = jnp.dot(h, wqv_ref[...], preferred_element_type=jnp.float32) + bqv
    qk = qv[:, :d]
    v = qv[:, d:]

    # ---- head-batched attention: (n, H*hd) -> (H, n, hd), leading batch ----
    q3 = pltpu.einshape("mhd->hmd", qk.reshape(n, num_heads, head_dim))
    v3 = pltpu.einshape("mhd->hmd", v.reshape(n, num_heads, head_dim))

    scores = jnp.einsum("hqd,hkd->hqk", q3, q3,
                        preferred_element_type=jnp.float32)        # (H, n, n)

    m = jnp.max(scores, axis=-1, keepdims=True)
    e = jnp.exp(scores - m)
    s = jnp.sum(e, axis=-1, keepdims=True)
    p = e * pl.reciprocal(s, approx=True)

    attn3 = jnp.einsum("hqk,hkd->hqd", p, v3,
                       preferred_element_type=jnp.float32)         # (H, n, hd)
    attn = pltpu.einshape("hmd->mhd", attn3).reshape(n, d)         # (n, d)

    attn = jnp.dot(attn, wo_ref[...], preferred_element_type=jnp.float32) + bo
    h1 = attn + x

    # ---- MLP branch (layer_norm2 affine folded into w1/b1) ----
    h2 = _normalize(h1, eps)
    h2 = jnp.dot(h2, w1_ref[...], preferred_element_type=jnp.float32) + b1
    h2 = _gelu_tanh(h2)
    h2 = jnp.dot(h2, w2_ref[...], preferred_element_type=jnp.float32) + b2

    out_ref[...] = h2 + h1


def siglip_encoder_layer(x, params):
    """x: (B, N, D) float32.  params: dict of weights (PyTorch layout)."""
    B, N, D = x.shape
    I = params["w1"].shape[0]
    T = B * N
    P = max(2 * D, I)

    g1, be1 = params["g1"], params["be1"]
    g2, be2 = params["g2"], params["be2"]

    # nn.Linear weights are (out, in) -> transpose to (in, out), then fold the
    # LayerNorm affines and sqrt(scale) in at trace time (one-time constants).
    wq_t = params["wq"].T
    wv_t = params["wv"].T
    ss = float(SCALE) ** 0.5                       # sqrt of softmax scale
    wq_f = (g1[:, None] * wq_t) * ss               # LN1 gamma + sqrt(scale)
    wv_f = g1[:, None] * wv_t                      # LN1 gamma
    bq_f = (params["bq"] + be1 @ wq_t) * ss        # LN1 beta + sqrt(scale)
    bv_f = params["bv"] + be1 @ wv_t               # LN1 beta

    wqv_t = jnp.concatenate([wq_f, wv_f], axis=1)  # (D, 2D) fused q/v
    bqv = jnp.concatenate([bq_f, bv_f], axis=0)    # (2D,)

    wo_t = params["wo"].T                          # (D, D)
    w1_t = g2[:, None] * params["w1"].T            # (D, I)  LN2 gamma folded
    b1_f = params["b1"] + be2 @ params["w1"].T     # (I,)    LN2 beta folded
    w2_t = params["w2"].T                          # (I, D)

    # Pack the 4 remaining small vectors into one (4, P) slab -> fewer inputs.
    pad = lambda v: jnp.pad(v, (0, P - v.shape[0]))
    pvec = jnp.stack([pad(bqv), pad(b1_f), pad(params["bo"]),
                      pad(params["b2"])], axis=0)  # (4, P)

    x2d = x.reshape(T, D)                          # batch folded into rows

    kernel = functools.partial(encoder_layer_kernel, num_heads=NUM_HEADS,
                               head_dim=HEAD_DIM, eps=LN_EPS)

    def resident(shape):
        return pl.BlockSpec(shape, lambda b: (0,) * len(shape))

    out2d = pl.pallas_call(
        kernel,
        out_shape=jax.ShapeDtypeStruct((T, D), jnp.float32),
        grid_spec=pltpu.PrefetchScalarGridSpec(
            num_scalar_prefetch=0,
            grid=(B,),                              # one sequence per step
            in_specs=[
                pl.BlockSpec((N, D), lambda b: (b, 0)),   # tokens of seq b
                resident((D, 2 * D)),                     # fused q/v weights
                resident((D, D)),                         # out_proj
                resident((D, I)),                         # fc1
                resident((I, D)),                         # fc2
                resident((4, P)),                         # packed biases
            ],
            out_specs=pl.BlockSpec((N, D), lambda b: (b, 0)),
        ),
        compiler_params=pltpu.CompilerParams(
            dimension_semantics=("parallel",)),           # 2-TC shard on v7x
    )(x2d, wqv_t, wo_t, w1_t, w2_t, pvec)

    return out2d.reshape(B, N, D)

    # TODO(synk): for real SigLIP shapes (D=1152, I=4304, N=729), tile fc1/fc2
    # over I ("arbitrary" axis), tokens over a "parallel" row axis, cast
    # weights/activations to bf16 (f32 accumulation) and raise vmem_limit_bytes.


# --------------------------- pure-JAX reference ---------------------------
def reference_forward(x, p):
    def ln(x, g, b):
        mu = jnp.mean(x, axis=-1, keepdims=True)
        var = jnp.mean((x - mu) ** 2, axis=-1, keepdims=True)
        return (x - mu) / jnp.sqrt(var + LN_EPS) * g + b

    B, N, D = x.shape
    residual = x
    h = ln(x, p["g1"], p["be1"])
    q = h @ p["wq"].T + p["bq"]
    k = h @ p["wq"].T + p["bq"]          # reference bug: key uses q_proj
    v = h @ p["wv"].T + p["bv"]
    q = q.reshape(B, N, NUM_HEADS, HEAD_DIM).transpose(0, 2, 1, 3)
    k = k.reshape(B, N, NUM_HEADS, HEAD_DIM).transpose(0, 2, 1, 3)
    v = v.reshape(B, N, NUM_HEADS, HEAD_DIM).transpose(0, 2, 1, 3)
    scores = jnp.einsum("bhqd,bhkd->bhqk", q, k) * SCALE
    w = jax.nn.softmax(scores.astype(jnp.float32), axis=-1)
    attn = jnp.einsum("bhqk,bhkd->bhqd", w, v)
    attn = attn.transpose(0, 2, 1, 3).reshape(B, N, D)
    attn = attn @ p["wo"].T + p["bo"]
    h1 = attn + residual
    h2 = ln(h1, p["g2"], p["be2"])
    h2 = _gelu_tanh(h2 @ p["w1"].T + p["b1"])
    h2 = h2 @ p["w2"].T + p["b2"]
    return h2 + h1


if __name__ == "__main__":
    key = jax.random.PRNGKey(0)
    keys = jax.random.split(key, 16)

    def nrm(k, shape, s=0.02):
        return jax.random.normal(k, shape, dtype=jnp.float32) * s

    params = {
        "wq": nrm(keys[0], (HIDDEN, HIDDEN)), "bq": nrm(keys[1], (HIDDEN,)),
        "wv": nrm(keys[2], (HIDDEN, HIDDEN)), "bv": nrm(keys[3], (HIDDEN,)),
        "wo": nrm(keys[4], (HIDDEN, HIDDEN)), "bo": nrm(keys[5], (HIDDEN,)),
        "g1": jnp.ones((HIDDEN,), jnp.float32) + nrm(keys[11], (HIDDEN,)),
        "be1": nrm(keys[12], (HIDDEN,)),
        "g2": jnp.ones((HIDDEN,), jnp.float32) + nrm(keys[13], (HIDDEN,)),
        "be2": nrm(keys[14], (HIDDEN,)),
        "w1": nrm(keys[6], (INTERMEDIATE, HIDDEN)), "b1": nrm(keys[7], (INTERMEDIATE,)),
        "w2": nrm(keys[8], (HIDDEN, INTERMEDIATE)), "b2": nrm(keys[9], (HIDDEN,)),
    }

    x = jax.random.normal(keys[10], (BATCH, NUM_PATCHES, HIDDEN), dtype=jnp.float32)

    out = siglip_encoder_layer(x, params)
    out = jax.block_until_ready(out)

    ref = reference_forward(x, params)
    err = float(jnp.max(jnp.abs(out - ref)))
    assert jnp.allclose(out, ref, atol=5e-4, rtol=5e-4), err

    print("KERNEL_OK")
</pallas_src>

<mosaic_0001>
module attributes {stable_mosaic.version = 11 : i64} {
  func.func @encoder_layer_kernel(%arg0: i32, %arg1: memref<16x32xf32, #tpu.memory_space<vmem>>, %arg2: memref<32x64xf32, #tpu.memory_space<vmem>>, %arg3: memref<32x32xf32, #tpu.memory_space<vmem>>, %arg4: memref<32x64xf32, #tpu.memory_space<vmem>>, %arg5: memref<64x32xf32, #tpu.memory_space<vmem>>, %arg6: memref<4x64xf32, #tpu.memory_space<vmem>>, %arg7: memref<16x32xf32, #tpu.memory_space<vmem>>) attributes {dimension_semantics = [#tpu.dimension_semantics<parallel>], iteration_bounds = array<i64: 2>, scalar_prefetch = 0 : i64, scratch_operands = 0 : i64, tpu.core_type = #tpu.core_type<tc>, window_params = [{transform_indices = @transform_0, window_bounds = array<i64: 16, 32>}, {pipeline_mode = #tpu.pipeline_mode<synchronous>, transform_indices = @transform_1, window_bounds = array<i64: 32, 64>}, {pipeline_mode = #tpu.pipeline_mode<synchronous>, transform_indices = @transform_2, window_bounds = array<i64: 32, 32>}, {pipeline_mode = #tpu.pipeline_mode<synchronous>, transform_indices = @transform_3, window_bounds = array<i64: 32, 64>}, {pipeline_mode = #tpu.pipeline_mode<synchronous>, transform_indices = @transform_4, window_bounds = array<i64: 64, 32>}, {pipeline_mode = #tpu.pipeline_mode<synchronous>, transform_indices = @transform_5, window_bounds = array<i64: 4, 64>}, {transform_indices = @transform_6, window_bounds = array<i64: 16, 32>}]} {
    %c0 = arith.constant 0 : index
    %c0_0 = arith.constant 0 : index
    %0 = vector.load %arg1[%c0, %c0_0] : memref<16x32xf32, #tpu.memory_space<vmem>>, vector<16x32xf32>
    %c0_1 = arith.constant 0 : index
    %c0_2 = arith.constant 0 : index
    %1 = vector.load %arg6[%c0_1, %c0_2] : memref<4x64xf32, #tpu.memory_space<vmem>>, vector<4x64xf32>
    %2 = vector.extract_strided_slice %1 {offsets = [0, 0], sizes = [1, 64], strides = [1, 1]} : vector<4x64xf32> to vector<1x64xf32>
    %3 = vector.extract_strided_slice %1 {offsets = [1, 0], sizes = [1, 64], strides = [1, 1]} : vector<4x64xf32> to vector<1x64xf32>
    %4 = vector.extract_strided_slice %1 {offsets = [2, 0], sizes = [1, 32], strides = [1, 1]} : vector<4x64xf32> to vector<1x32xf32>
    %5 = vector.extract_strided_slice %1 {offsets = [3, 0], sizes = [1, 32], strides = [1, 1]} : vector<4x64xf32> to vector<1x32xf32>
    %cst = arith.constant dense<0.000000e+00> : vector<16xf32>
    %6 = vector.multi_reduction <add>, %0, %cst [1] : vector<16x32xf32> to vector<16xf32>
    %7 = vector.shape_cast %6 : vector<16xf32> to vector<16x1xf32>
    %cst_3 = arith.constant 3.200000e+01 : f32
    %8 = vector.broadcast %cst_3 : f32 to vector<16x1xf32>
    %9 = arith.divf %7, %8 : vector<16x1xf32>
    %10 = vector.broadcast %9 : vector<16x1xf32> to vector<16x32xf32>
    %11 = arith.subf %0, %10 : vector<16x32xf32>
    %12 = arith.mulf %11, %11 : vector<16x32xf32>
    %cst_4 = arith.constant dense<0.000000e+00> : vector<16xf32>
    %13 = vector.multi_reduction <add>, %12, %cst_4 [1] : vector<16x32xf32> to vector<16xf32>
    %14 = vector.shape_cast %13 : vector<16xf32> to vector<16x1xf32>
    %cst_5 = arith.constant 3.200000e+01 : f32
    %15 = vector.broadcast %cst_5 : f32 to vector<16x1xf32>
    %16 = arith.divf %14, %15 : vector<16x1xf32>
    %17 = vector.broadcast %9 : vector<16x1xf32> to vector<16x32xf32>
    %18 = arith.subf %0, %17 : vector<16x32xf32>
    %cst_6 = arith.constant 9.99999997E-7 : f32
    %19 = vector.broadcast %cst_6 : f32 to vector<16x1xf32>
    %20 = arith.addf %16, %19 : vector<16x1xf32>
    %21 = math.rsqrt %20 : vector<16x1xf32>
    %22 = vector.broadcast %21 : vector<16x1xf32> to vector<16x32xf32>
    %23 = arith.mulf %18, %22 : vector<16x32xf32>
    %c0_7 = arith.constant 0 : index
    %c0_8 = arith.constant 0 : index
    %24 = vector.load %arg2[%c0_7, %c0_8] : memref<32x64xf32, #tpu.memory_space<vmem>>, vector<32x64xf32>
    %cst_9 = arith.constant dense<0.000000e+00> : vector<16x64xf32>
    %25 = tpu.matmul %23, %24, %cst_9 {dimension_numbers = #tpu.dot_dimension_numbers<[1], [0], [0], [1], [0, 0, 1, 1], [], []>} : vector<16x32xf32>, vector<32x64xf32>, vector<16x64xf32> -> vector<16x64xf32>
    %26 = vector.broadcast %2 : vector<1x64xf32> to vector<16x64xf32>
    %27 = arith.addf %25, %26 : vector<16x64xf32>
    %28 = vector.extract_strided_slice %27 {offsets = [0, 0], sizes = [16, 32], strides = [1, 1]} : vector<16x64xf32> to vector<16x32xf32>
    %29 = vector.extract_strided_slice %27 {offsets = [0, 32], sizes = [16, 32], strides = [1, 1]} : vector<16x64xf32> to vector<16x32xf32>
    %30 = vector.shape_cast %28 : vector<16x32xf32> to vector<16x4x8xf32>
    %31 = tpu.transpose %30, [1, 0, 2] : vector<16x4x8xf32> -> vector<4x16x8xf32>
    %32 = vector.shape_cast %29 : vector<16x32xf32> to vector<16x4x8xf32>
    %33 = tpu.transpose %32, [1, 0, 2] : vector<16x4x8xf32> -> vector<4x16x8xf32>
    "tpu.trace_start"() <{level = 10 : i32, message = "hqd,hkd->hqk"}> : () -> ()
    %cst_10 = arith.constant dense<0.000000e+00> : vector<4x16x16xf32>
    %34 = tpu.matmul %31, %31, %cst_10 {dimension_numbers = #tpu.dot_dimension_numbers<[2], [2], [1], [1], [0, 0, 0, 1, 1, 1], [0], [0]>} : vector<4x16x8xf32>, vector<4x16x8xf32>, vector<4x16x16xf32> -> vector<4x16x16xf32>
    "tpu.trace_stop"() : () -> ()
    %cst_11 = arith.constant dense<0xFF800000> : vector<4x16xf32>
    %35 = vector.multi_reduction <maximumf>, %34, %cst_11 [2] : vector<4x16x16xf32> to vector<4x16xf32>
    %36 = vector.shape_cast %35 : vector<4x16xf32> to vector<4x16x1xf32>
    %37 = vector.broadcast %36 : vector<4x16x1xf32> to vector<4x16x16xf32>
    %38 = arith.subf %34, %37 : vector<4x16x16xf32>
    %39 = math.exp %38 : vector<4x16x16xf32>
    %cst_12 = arith.constant dense<0.000000e+00> : vector<4x16xf32>
    %40 = vector.multi_reduction <add>, %39, %cst_12 [2] : vector<4x16x16xf32> to vector<4x16xf32>
    %41 = vector.shape_cast %40 : vector<4x16xf32> to vector<4x16x1xf32>
    %42 = tpu.reciprocal %41 {approx = true} : vector<4x16x1xf32> -> vector<4x16x1xf32>
    %43 = vector.broadcast %42 : vector<4x16x1xf32> to vector<4x16x16xf32>
    %44 = arith.mulf %39, %43 : vector<4x16x16xf32>
    "tpu.trace_start"() <{level = 10 : i32, message = "hqk,hkd->hqd"}> : () -> ()
    %cst_13 = arith.constant dense<0.000000e+00> : vector<4x16x8xf32>
    %45 = tpu.matmul %44, %33, %cst_13 {dimension_numbers = #tpu.dot_dimension_numbers<[2], [1], [1], [2], [0, 0, 0, 1, 1, 2], [0], [0]>} : vector<4x16x16xf32>, vector<4x16x8xf32>, vector<4x16x8xf32> -> vector<4x16x8xf32>
    "tpu.trace_stop"() : () -> ()
    %46 = tpu.transpose %45, [1, 0, 2] : vector<4x16x8xf32> -> vector<16x4x8xf32>
    %47 = vector.shape_cast %46 : vector<16x4x8xf32> to vector<16x32xf32>
    %c0_14 = arith.constant 0 : index
    %c0_15 = arith.constant 0 : index
    %48 = vector.load %arg3[%c0_14, %c0_15] : memref<32x32xf32, #tpu.memory_space<vmem>>, vector<32x32xf32>
    %cst_16 = arith.constant dense<0.000000e+00> : vector<16x32xf32>
    %49 = tpu.matmul %47, %48, %cst_16 {dimension_numbers = #tpu.dot_dimension_numbers<[1], [0], [0], [1], [0, 0, 1, 1], [], []>} : vector<16x32xf32>, vector<32x32xf32>, vector<16x32xf32> -> vector<16x32xf32>
    %50 = vector.broadcast %4 : vector<1x32xf32> to vector<16x32xf32>
    %51 = arith.addf %49, %50 : vector<16x32xf32>
    %52 = arith.addf %51, %0 : vector<16x32xf32>
    %cst_17 = arith.constant dense<0.000000e+00> : vector<16xf32>
    %53 = vector.multi_reduction <add>, %52, %cst_17 [1] : vector<16x32xf32> to vector<16xf32>
    %54 = vector.shape_cast %53 : vector<16xf32> to vector<16x1xf32>
    %cst_18 = arith.constant 3.200000e+01 : f32
    %55 = vector.broadcast %cst_18 : f32 to vector<16x1xf32>
    %56 = arith.divf %54, %55 : vector<16x1xf32>
    %57 = vector.broadcast %56 : vector<16x1xf32> to vector<16x32xf32>
    %58 = arith.subf %52, %57 : vector<16x32xf32>
    %59 = arith.mulf %58, %58 : vector<16x32xf32>
    %cst_19 = arith.constant dense<0.000000e+00> : vector<16xf32>
    %60 = vector.multi_reduction <add>, %59, %cst_19 [1] : vector<16x32xf32> to vector<16xf32>
    %61 = vector.shape_cast %60 : vector<16xf32> to vector<16x1xf32>
    %cst_20 = arith.constant 3.200000e+01 : f32
    %62 = vector.broadcast %cst_20 : f32 to vector<16x1xf32>
    %63 = arith.divf %61, %62 : vector<16x1xf32>
    %64 = vector.broadcast %56 : vector<16x1xf32> to vector<16x32xf32>
    %65 = arith.subf %52, %64 : vector<16x32xf32>
    %cst_21 = arith.constant 9.99999997E-7 : f32
    %66 = vector.broadcast %cst_21 : f32 to vector<16x1xf32>
    %67 = arith.addf %63, %66 : vector<16x1xf32>
    %68 = math.rsqrt %67 : vector<16x1xf32>
    %69 = vector.broadcast %68 : vector<16x1xf32> to vector<16x32xf32>
    %70 = arith.mulf %65, %69 : vector<16x32xf32>
    %c0_22 = arith.constant 0 : index
    %c0_23 = arith.constant 0 : index
    %71 = vector.load %arg4[%c0_22, %c0_23] : memref<32x64xf32, #tpu.memory_space<vmem>>, vector<32x64xf32>
    %cst_24 = arith.constant dense<0.000000e+00> : vector<16x64xf32>
    %72 = tpu.matmul %70, %71, %cst_24 {dimension_numbers = #tpu.dot_dimension_numbers<[1], [0], [0], [1], [0, 0, 1, 1], [], []>} : vector<16x32xf32>, vector<32x64xf32>, vector<16x64xf32> -> vector<16x64xf32>
    %73 = vector.broadcast %3 : vector<1x64xf32> to vector<16x64xf32>
    %74 = arith.addf %72, %73 : vector<16x64xf32>
    %cst_25 = arith.constant 0.636619746 : f32
    %75 = math.sqrt %cst_25 : f32
    %cst_26 = arith.constant 5.000000e-01 : f32
    %76 = vector.broadcast %cst_26 : f32 to vector<16x64xf32>
    %77 = arith.mulf %76, %74 : vector<16x64xf32>
    %cst_27 = arith.constant 4.471500e-02 : f32
    %78 = vector.broadcast %cst_27 : f32 to vector<16x64xf32>
    %79 = arith.mulf %78, %74 : vector<16x64xf32>
    %80 = arith.mulf %79, %74 : vector<16x64xf32>
    %81 = arith.mulf %80, %74 : vector<16x64xf32>
    %82 = arith.addf %74, %81 : vector<16x64xf32>
    %83 = vector.broadcast %75 : f32 to vector<16x64xf32>
    %84 = arith.mulf %83, %82 : vector<16x64xf32>
    %85 = math.tanh %84 : vector<16x64xf32>
    %cst_28 = arith.constant 1.000000e+00 : f32
    %86 = vector.broadcast %cst_28 : f32 to vector<16x64xf32>
    %87 = arith.addf %86, %85 : vector<16x64xf32>
    %88 = arith.mulf %77, %87 : vector<16x64xf32>
    %c0_29 = arith.constant 0 : index
    %c0_30 = arith.constant 0 : index
    %89 = vector.load %arg5[%c0_29, %c0_30] : memref<64x32xf32, #tpu.memory_space<vmem>>, vector<64x32xf32>
    %cst_31 = arith.constant dense<0.000000e+00> : vector<16x32xf32>
    %90 = tpu.matmul %88, %89, %cst_31 {dimension_numbers = #tpu.dot_dimension_numbers<[1], [0], [0], [1], [0, 0, 1, 1], [], []>} : vector<16x64xf32>, vector<64x32xf32>, vector<16x32xf32> -> vector<16x32xf32>
    %91 = vector.broadcast %5 : vector<1x32xf32> to vector<16x32xf32>
    %92 = arith.addf %90, %91 : vector<16x32xf32>
    %93 = arith.addf %92, %52 : vector<16x32xf32>
    %c0_32 = arith.constant 0 : index
    %c0_33 = arith.constant 0 : index
    %94 = vector.load %arg7[%c0_32, %c0_33] : memref<16x32xf32, #tpu.memory_space<vmem>>, vector<16x32xf32>
    tpu.vector_store %arg7[%c0_32, %c0_33], %93 {strides = array<i32>} : memref<16x32xf32, #tpu.memory_space<vmem>>, vector<16x32xf32>,
    return
  }
  func.func @transform_0(%arg0: i32) -> (i32, i32) {
    %c0_i32 = arith.constant 0 : i32
    %c0_i32_0 = arith.constant 0 : i32
    return %arg0, %c0_i32 : i32, i32
  }
  func.func @transform_1(%arg0: i32) -> (i32, i32) {
    %c0_i32 = arith.constant 0 : i32
    %c0_i32_0 = arith.constant 0 : i32
    %c0_i32_1 = arith.constant 0 : i32
    return %c0_i32, %c0_i32_0 : i32, i32
  }
  func.func @transform_2(%arg0: i32) -> (i32, i32) {
    %c0_i32 = arith.constant 0 : i32
    %c0_i32_0 = arith.constant 0 : i32
    %c0_i32_1 = arith.constant 0 : i32
    return %c0_i32, %c0_i32_0 : i32, i32
  }
  func.func @transform_3(%arg0: i32) -> (i32, i32) {
    %c0_i32 = arith.constant 0 : i32
    %c0_i32_0 = arith.constant 0 : i32
    %c0_i32_1 = arith.constant 0 : i32
    return %c0_i32, %c0_i32_0 : i32, i32
  }
  func.func @transform_4(%arg0: i32) -> (i32, i32) {
    %c0_i32 = arith.constant 0 : i32
    %c0_i32_0 = arith.constant 0 : i32
    %c0_i32_1 = arith.constant 0 : i32
    return %c0_i32, %c0_i32_0 : i32, i32
  }
  func.func @transform_5(%arg0: i32) -> (i32, i32) {
    %c0_i32 = arith.constant 0 : i32
    %c0_i32_0 = arith.constant 0 : i32
    %c0_i32_1 = arith.constant 0 : i32
    return %c0_i32, %c0_i32_0 : i32, i32
  }
  func.func @transform_6(%arg0: i32) -> (i32, i32) {
    %c0_i32 = arith.constant 0 : i32
    %c0_i32_0 = arith.constant 0 : i32
    return %arg0, %c0_i32 : i32, i32
  }
}

</mosaic_0001>

<bundles_post_ra>
// kernel: tpu_custom_call.1
= control target key start
LH: loop header
LB: loop body
LE: loop exit
PB: predicated region body
PF: predicated region fallthrough
CT: control target
= control target key end

     0   :  { %11 = vsyncpa [#allocation3], 0  ;;  %s3464_s0 = inlined_call_operand.vmem [shape: f32[32,32], index: 0, kind: input, shape index: {}]   ;;  %s3465_s1 = inlined_call_operand.vmem [shape: f32[32,64], index: 1, kind: input, shape index: {}]   ;;  %s3466_s2 = inlined_call_operand.vmem [shape: f32[32,32], index: 2, kind: input, shape index: {}]   ;;  %s3467_s3 = inlined_call_operand.hbm [shape: f32[32,64], index: 3, kind: input, shape index: {}]   ;;  %s3468_s4 = inlined_call_operand.vmem [shape: f32[64,32], index: 4, kind: input, shape index: {}]   ;;  %s3469_s5 = inlined_call_operand.vmem [shape: f32[4,64], index: 5, kind: input, shape index: {}]   ;;  %s3470_s6 = inlined_call_operand.hbm [shape: f32[32,32], index: 6, kind: output, shape index: {}]  }
   0x1   :  { %12 = vsyncpa [#allocation4], 0 }
   0x2   :  { %14 = vsyncpa [#allocation4 + $0x1], 0  ;;  %s2986_s21 = smov 0   ;;  %s2988_s22 = smov 0  }
   0x3   :  { %s2990_s23 = smov 0   ;;  %s2992_s24 = smov 0  }
   0x4 LB: > { %s3007_s25 = sadd.s32 4294967295, %s2935_s24   ;;  %s2427_s26 = sadd.s32 4294967294, %s2935_s24   ;;  %s2935_s24 = sphi %s2992_s24, %s3488_s24   ;;  %s2931_s23 = sphi %s2990_s23, %s3487_s23   ;;  %s2927_s22 = sphi %s2988_s22, %s3486_s22   ;;  %s2923_s21 = sphi %s2986_s21, %s3485_s21  }
   0x5   : > { %s3011_s27 = sadd.s32 1, %s2935_s24   ;;  %s158_s28 = sadd.s32 1, %s2931_s23 }
   0x6   : > { %s155_s29 = ssub.s32 %s2935_s24, %s3011_s27  ;;  %p168_p0 = scmp.ne.s32.totalorder %s2931_s23, %s2927_s22 }
   0x7   : > { %p156_p1 = scmp.eq.s32.totalorder %s155_s29, 0  ;;  %p169_p2 = scmp.eq.s32.totalorder %s3007_s25, 1 }
   0x8   : > { %p174_p3 = scmp.ne.s32.totalorder %s2927_s22, %s2923_s21  ;;  %p175_p4 = scmp.eq.s32.totalorder %s2427_s26, 1 }
   0x9   : > { %s3022_s30 = scalar_select %p156_p1, %s2931_s23, %s158_s28  }
   0xa   : > { %p3024_p5 = por %p169_p2, %p168_p0  ;;  %p3028_p6 = por %p175_p4, %p174_p3 }
   0xb   : > { %p2428_p7 = scmp.ge.s32.totalorder %s2935_s24, 1  ;;  %p182_p8 = scmp.lt.s32.totalorder %s2935_s24, 3 }
   0xc   : > { %s3474_s7 = scalar_select %p3024_p5, 1, 0 }
   0xd   : > { %s3475_s8 = scalar_select %p3028_p6, 1, 0 }
   0xe   : > { %p3471_p9 = scmp.eq.s32.totalorder %s3007_s25, 0  ;;  %p3035_p10 = pnand %p2428_p7, %p182_p8 }
   0xf   : > { %s2937_s10 = smov [#allocation2]   ;;  %s2841_s15 = scalar_lea.hbm %s3467_s3, 512 }
  0x10   : > { %s3476_s9 = scalar_select %p3035_p10, 1, 0 }
  0x11   : > { %s200_s11 = sshll.u32 %s2937_s10, 4  ;;  %p2740_p11 = pneg %p3035_p10  ;;  %s201_s11 = int_to_ptr.vmem [resolvable:$true] %s200_s11 }
  0x12   : > { %p2842_p13 = scmp.ne.s32.totalorder %s3467_s3, %s2841_s15  ;;  %p2848_p3 = scmp.lt.u32.totalorder %s2841_s15, %s3467_s3 }
  0x13   : > { %p3043_p12 = pnand %p3471_p9, %p2740_p11 }
  0x15   : > { %p2843_p0 = pneg %p3043_p12 }
  0x17   : > { %p2844_p1 = pnand %p2843_p0, %p2842_p13 }
  0x19   : > { %p2845_p2 = pneg %p2844_p1 }
  0x1b   : > { %p2850_p4 = pnand %p2848_p3, %p2845_p2 }
  0x1d   : > { %2853 = shalt.err (!%p2850_p4)
}
  0x1e   : > { %s2854_s20 = scalar_lea.vmem %s201_s11, 512  ;;  %p2862_p9 = scmp.lt.s32.totalorder %s201_s11, %s201_s11 }
  0x1f   : > { %p2855_p7 = scmp.ne.s32.totalorder %s201_s11, %s2854_s20  ;;  %p2863_p6 = scmp.lt.s32.totalorder %s2854_s20, %s2854_s20 }
  0x21   : > { %p2857_p8 = pnand %p2855_p7, %p2843_p0  ;;  %p2864_p5 = por %p2863_p6, %p2862_p9 }
  0x23   : > { %p2858_p11 = pneg %p2857_p8 }
  0x25   : > { %p2865_p10 = pnand %p2864_p5, %p2858_p11 }
  0x27   : > { %2868 = shalt.err (!%p2865_p10)
}
  0x28   : > { %s2938_s26 = smov 128   ;;  %s2939_s28 = smov 8  }
  0x29   : > { %2743 = dma.hbm_to_vmem [thread:$0]  (!%p3043_p12), %s3467_s3, 512, %s201_s11, [#allocation3], %s2938_s26, %s2938_s26, %s2939_s28  }
  0x2a   : > { %p3478_p13 = scmp.ne.s32.totalorder %s3476_s9, 0 }
  0x2b   : > { %p3479_p1 = scmp.eq.s32.totalorder (!%p3478_p13), %s3007_s25, 0 }
  0x2c   : > { %231 = sbr.rel (%p3478_p13) target bundleno = 2649 (0xa59), region = 44 }
  0x33   : > { %2914 = dma.done.wait (%p3479_p1), [#allocation3], 512   ;;  %p3480_p0 = pmov %p3479_p1 }
  0x34   : > { %s2434_s13 = sshll.u32 %s3007_s25, 1  ;;  %vm271_vm0 = vcmask 261120   ;;  %v299_v14 = vld [vmem:[%s3465_s1] sm:$0xff]  ;;  %v300_v15 = vld [vmem:[%s3465_s1 + $0x8] sm:$0xff]  ;;  %v301_v16 = vld [vmem:[%s3465_s1 + $0x10] sm:$0xff]  ;;  %v303_v30 = vlaneseq  ;;  %s2942_s12 = smov 104  }
  0x35   : > { %2916 = vsyncadd (%p3480_p0), [#allocation3], 4294966784  ;;  %p262_p5 = scmp.lt.s32.totalorder %s2434_s13, 3  ;;  %v2654_v17 = vpack.c.bf16 %v300_v15, %v299_v14  ;;  %v302_v18 = vld [vmem:[%s3465_s1 + $0x18] sm:$0xff]  ;;  %v3105_v33 = vld [vmem:[%s3469_s5] sm:$0xf] }
  0x36   : > { %v2658_v19 = vpack.c.bf16 %v302_v18, %v301_v16  ;;  %v3099_v31 = vshrl.u32 %v303_v30, 7  ;;  %v2943_v39 = vmov 1983009808   ;;  %v2944_v43 = vmov 1934713408   ;;  %s2945_s15 = smov 96  }
  0x37   : > { %s3490_s13 = smov (!%p262_p5, %s2434_s13), 3  ;;  %2655 = vmatprep.subr.bf16.mxu1 %v2654_v17  ;;  %v411_v40 = vunpack.c.l.s4 %v2943_v39  ;;  %v443_v44 = vunpack.c.l.s4 %v2944_v43  ;;  %vm976_vm1 = vcmask 64512   ;;  %vm1301_vm3 = vcmask 130048   ;;  %s2946_s28 = smov 8  }
  0x38   : > { %s2435_s14 = sshll.u32 %s3490_s13, 3  ;;  %2657 = vmatpush3.bf16.msra.mxu1 %v2654_v17  ;;  %v305_v32 = vsub.s32 0, %v3099_v31  ;;  %s2940_s13 = smov 120   ;;  %vm3188_vm2 = vmpackc.low %vm976_vm1, %vm976_vm1  ;;  %vm2014_vm4 = vcmask 195584   ;;  %vm2253_vm5 = vcmask 523264  }
  0x39   : > { %s265_s16 = scalar_lea.vmem %s3464_s0, %s2435_s14  ;;  %2659 = vmatprep.subr.bf16.mxu1 %v2658_v19  ;;  %s2941_s14 = smov 112   ;;  %v412_v45 = vunpack.c.0.s8 %v411_v40  ;;  %v444_v48 = vunpack.c.0.s8 %v443_v44 }
  0x3a   : > { %v3073_v0 = vld [vmem:[%s265_s16] sm:$0xff]  ;;  %v3075_v1 = vld [vmem:[%s265_s16 + $0x8] sm:$0xff]  ;;  %v306_v34 = vrot.slane %v3105_v33, %v305_v32  ;;  %s2947_s29 = smov 16   ;;  %s2948_s10 = smov 24  }
  0x3b   : > { %v272_v2 = vsel %vm271_vm0, %v3073_v0, 0.0  ;;  %v275_v3 = vsel %vm271_vm0, %v3075_v1, 0.0  ;;  %v3127_v49 = vsub.s32 %v412_v45, %v3099_v31  ;;  %v3140_v55 = vsub.s32 %v444_v48, %v3099_v31  ;;  %s258_s16 = sand.u32 1, %s2927_s22   ;;  %s2485_s11 = sshll.u32 %s3007_s25, 8 }
  0x3c   : > { %273 = vadd.xlane.f32.xlu0 %v272_v2  ;;  %2661 = vmatpush3.bf16.msra.mxu1 %v2658_v19  ;;  %s2433_s9 = sshll.u32 %s258_s16, 4  ;;  %s3415_s26 = scalar_lea.hbm %s3470_s6, %s2485_s11 }
  0x3d   : > { %s260_s17 = scalar_lea.vmem [#allocation5], %s2433_s9  ;;  %s3422_s25 = scalar_lea.sflag [#allocation4], %s258_s16 }
  0x3e   : > { %s2353_s18 = sshll.u32 %s260_s17, 4  ;;  %p3483_p9 = scmp.ne.s32.totalorder %s3474_s7, 0  ;;  %s3418_s18 = int_to_ptr.vmem [resolvable:$true] %s2353_s18 }
  0x40   : > { %276 = vadd.xlane.f32.xlu0 %v275_v3 }
  0xc9   : > { %v274_v4 = vpop.xlane.xlu0 %273 }
  0xca   : > { %v279_v5 = vmul.f32 0.03125, %v274_v4 }
  0xcc   : > { %v281_v6 = vsub.f32 %v3073_v0, %v279_v5 }
  0xcd   : > { %v277_v7 = vpop.xlane.xlu0 %276 }
  0xce   : > { %v280_v8 = vmul.f32 0.03125, %v277_v7  ;;  %v283_v9 = vmul.f32 %v281_v6, %v281_v6 }
  0xd0   : > { %v282_v10 = vsub.f32 %v3075_v1, %v280_v8  ;;  %v285_v11 = vsel %vm271_vm0, %v283_v9, 0.0 }
  0xd1   : > { %286 = vadd.xlane.f32.xlu1 %v285_v11 }
  0xd2   : > { %v284_v12 = vmul.f32 %v282_v10, %v282_v10 }
  0xd4   : > { %v288_v13 = vsel %vm271_vm0, %v284_v12, 0.0 }
  0xd5   : > { %289 = vadd.xlane.f32.xlu1 %v288_v13 }
 0x15e   : > { %v287_v20 = vpop.xlane.xlu1 %286 }
 0x15f   : > { %v291_v21 = vmul.f32 0.03125, %v287_v20 }
 0x161   : > { %v293_v22 = vadd.f32 1e-06, %v291_v21 }
 0x162   : > { %v290_v23 = vpop.xlane.xlu1 %289 }
 0x163   : > { %2796 = vrsqrt.f32 %v293_v22  ;;  %v292_v24 = vmul.f32 0.03125, %v290_v23 }
 0x165   : > { %v294_v25 = vadd.f32 1e-06, %v292_v24 }
 0x167   : > { %2798 = vrsqrt.f32 %v294_v25 }
 0x16d   : > { %v2797_v26 = vpop.eup %2796 }
 0x16e   : > { %v297_v27 = vmul.f32 %v2797_v26, %v281_v6 }
 0x170   : > { %2554 = vmatprep.mubr.msk.f32.mxu1 %vm271_vm0, %v297_v27 }
 0x171   : > { %v2799_v28 = vpop.eup %2798 }
 0x172   : > { %v298_v29 = vmul.f32 %v2799_v28, %v282_v10 }
 0x174   : > { %2555 = vmatmul.mubr.msk.f32.vlgmr.msra.gmra.mrb[0].mxu1 %vm271_vm0, %v298_v29 }
 0x247   : > { %v2556_v35 = vpop.f32.mrb[0].mxu1 }
 0x248   : > { %v3108_v36 = vadd.f32 %v2556_v35, %v306_v34  ;;  %v379_v37 = vpop.f32.mrb[1].mxu1 }
 0x249   : > { %v3110_v38 = vadd.f32 %v379_v37, %v306_v34 }
 0x24a   : > { %392 = vrot.lane.b32.xlu1 %v3108_v36, %s2940_s13 }
 0x24b   : > { %390 = vrot.lane.b32.xlu0 %v3110_v38, %s2940_s13 }
 0x24e   : > { %398 = vrot.lane.b32.xlu1 %v3108_v36, %s2941_s14 }
 0x24f   : > { %402 = vrot.lane.b32.xlu0 %v3110_v38, %s2942_s12 }
 0x252   : > { %396 = vrot.lane.b32.xlu1 %v3110_v38, %s2941_s14 }
 0x256   : > { %404 = vrot.lane.b32.xlu1 %v3108_v36, %s2942_s12 }
 0x2bc   : > { %v3118_v41 = vpop.permute.xlu1 %392 }
 0x2bd   : > { %v3120_v42 = vpop.permute.xlu0 %390 }
 0x2c0   : > { %v3122_v46 = vpop.permute.xlu1 %398 }
 0x2c1   : > { %v3124_v47 = vpop.permute.xlu0 %402  ;;  %v476_v60 = vcombine.low %v3108_v36, %v3122_v46  ;;  %v477_v61 = vcombine.high %v3108_v36, %v3122_v46 }
 0x2c2   : > { %v424_v50 = vcombine.low %v3120_v42, %v3124_v47  ;;  %v425_v51 = vcombine.high %v3120_v42, %v3124_v47 }
 0x2c3   : > { %v484_v11 = vrot.slane %v476_v60, %v3127_v49  ;;  %v491_v12 = vrot.slane %v477_v61, %v3127_v49 }
 0x2c4   : > { %v3133_v52 = vpop.permute.xlu1 %396  ;;  %v432_v56 = vrot.slane %v424_v50, %v3127_v49  ;;  %v439_v57 = vrot.slane %v425_v51, %v3127_v49 }
 0x2c5   : > { %v408_v53 = vcombine.low %v3110_v38, %v3133_v52  ;;  %v409_v54 = vcombine.high %v3110_v38, %v3133_v52 }
 0x2c7   : > { %v416_v58 = vrot.slane %v408_v53, %v3127_v49  ;;  %v423_v59 = vrot.slane %v409_v54, %v3127_v49 }
 0x2c8   : > { %v3150_v62 = vpop.permute.xlu1 %404 }
 0x2c9   : > { %v440_v63 = vcombine.low %v416_v58, %v432_v56  ;;  %v441_v2 = vcombine.high %v416_v58, %v432_v56  ;;  %v456_v3 = vcombine.low %v423_v59, %v439_v57  ;;  %v457_v4 = vcombine.high %v423_v59, %v439_v57 }
 0x2ca   : > { %v492_v5 = vcombine.low %v3118_v41, %v3150_v62  ;;  %v493_v6 = vcombine.high %v3118_v41, %v3150_v62 }
 0x2cb   : > { %v448_v7 = vrot.slane %v440_v63, %v3140_v55  ;;  %v455_v8 = vrot.slane %v441_v2, %v3140_v55  ;;  %v464_v9 = vrot.slane %v456_v3, %v3140_v55  ;;  %v471_v10 = vrot.slane %v457_v4, %v3140_v55 }
 0x2cc   : > { %v500_v13 = vrot.slane %v492_v5, %v3127_v49  ;;  %v507_v14 = vrot.slane %v493_v6, %v3127_v49 }
 0x2cd   : > { %v544_v15 = vcombine.low %v448_v7, %v455_v8  ;;  %v2438_v16 = vcombine.high %v448_v7, %v455_v8  ;;  %v560_v17 = vcombine.low %v464_v9, %v471_v10  ;;  %v2439_v18 = vcombine.high %v464_v9, %v471_v10 }
 0x2ce   : > { %v508_v19 = vcombine.low %v484_v11, %v500_v13  ;;  %v509_v20 = vcombine.high %v484_v11, %v500_v13  ;;  %v524_v21 = vcombine.low %v491_v12, %v507_v14  ;;  %v525_v22 = vcombine.high %v491_v12, %v507_v14 }
 0x2cf   : > { %v551_v23 = vrot.slane %v544_v15, %v3127_v49  ;;  %v559_v24 = vrot.slane %v2438_v16, %v3127_v49  ;;  %v567_v25 = vrot.slane %v560_v17, %v3127_v49  ;;  %v575_v26 = vrot.slane %v2439_v18, %v3127_v49 }
 0x2d0   : > { %v516_v27 = vrot.slane %v508_v19, %v3140_v55  ;;  %v523_v28 = vrot.slane %v509_v20, %v3140_v55  ;;  %v532_v29 = vrot.slane %v524_v21, %v3140_v55  ;;  %v539_v30 = vrot.slane %v525_v22, %v3140_v55 }
 0x2d1   : > { %v576_v32 = vcombine.low %v551_v23, %v559_v24  ;;  %v592_v34 = vcombine.low %v567_v25, %v575_v26  ;;  %v577_v45 = vcombine.high %v551_v23, %v559_v24  ;;  %v593_v48 = vcombine.high %v567_v25, %v575_v26 }
 0x2d2   : > { %v612_v35 = vcombine.low %v516_v27, %v523_v28  ;;  %v2440_v37 = vcombine.high %v516_v27, %v523_v28  ;;  %v628_v39 = vcombine.low %v532_v29, %v539_v30  ;;  %v2441_v40 = vcombine.high %v532_v29, %v539_v30 }
 0x2d3   : > { %v584_v43 = vrot.slane %v576_v32, %v3140_v55  ;;  %v600_v44 = vrot.slane %v592_v34, %v3140_v55  ;;  %v591_v63 = vrot.slane %v577_v45, %v3140_v55  ;;  %v607_v2 = vrot.slane %v593_v48, %v3140_v55 }
 0x2d4   : > { %v619_v50 = vrot.slane %v612_v35, %v3127_v49  ;;  %v627_v51 = vrot.slane %v2440_v37, %v3127_v49  ;;  %v635_v53 = vrot.slane %v628_v39, %v3127_v49  ;;  %v643_v54 = vrot.slane %v2441_v40, %v3127_v49 }
 0x2d5   : > { %v608_v56 = vcombine.low %v584_v43, %v600_v44  ;;  %v609_v57 = vcombine.high %v584_v43, %v600_v44  ;;  %v610_v14 = vcombine.low %v591_v63, %v607_v2  ;;  %v611_v15 = vcombine.high %v591_v63, %v607_v2 }
 0x2d6   : > { %v644_v58 = vcombine.low %v619_v50, %v627_v51  ;;  %v660_v59 = vcombine.low %v635_v53, %v643_v54  ;;  %v645_v60 = vcombine.high %v619_v50, %v627_v51  ;;  %v661_v61 = vcombine.high %v635_v53, %v643_v54 }
 0x2d7   : > { %2561 = vmatprep.mubr.msk.f32.mxu1 %vm976_vm1, %v608_v56  ;;  %2568 = vmatprep.mubr.msk.f32.mxu0 %vm976_vm1, %v609_v57 }
 0x2d8   : > { %v652_v3 = vrot.slane %v644_v58, %v3140_v55  ;;  %v668_v4 = vrot.slane %v660_v59, %v3140_v55  ;;  %v659_v5 = vrot.slane %v645_v60, %v3140_v55  ;;  %v675_v6 = vrot.slane %v661_v61, %v3140_v55 }
 0x2da   : > { %v676_v7 = vcombine.low %v652_v3, %v668_v4  ;;  %v677_v8 = vcombine.high %v652_v3, %v668_v4  ;;  %v678_v9 = vcombine.low %v659_v5, %v675_v6  ;;  %v679_v10 = vcombine.high %v659_v5, %v675_v6 }
 0x2dc   : > { %v2662_v12 = vpack.c.bf16 %v676_v7, %v608_v56  ;;  %v2668_v13 = vpack.c.bf16 %v677_v8, %v609_v57  ;;  %v2674_v16 = vpack.c.bf16 %v678_v9, %v610_v14  ;;  %v2680_v17 = vpack.c.bf16 %v679_v10, %v611_v15 }
 0x2de   : > { %2664 = vmatprep.subr.msk.bf16.mxu1 %vm3188_vm2, %v2662_v12  ;;  %2670 = vmatprep.subr.msk.bf16.mxu0 %vm3188_vm2, %v2668_v13 }
 0x2df   : > { %2667 = vmatpush3.bf16.xpose.msk.msra.mxu1 %vm3188_vm2, %v2662_v12  ;;  %2673 = vmatpush3.bf16.xpose.msk.msra.mxu0 %vm3188_vm2, %v2668_v13 }
 0x2e0   : > { %2676 = vmatprep.subr.msk.bf16.mxu1 %vm3188_vm2, %v2674_v16  ;;  %2682 = vmatprep.subr.msk.bf16.mxu0 %vm3188_vm2, %v2680_v17 }
 0x2e6   : > { %2562 = vmatmul.mubr.msk.f32.vlgmr.msra.gmra.mrb[2].mxu1 %vm976_vm1, %v676_v7  ;;  %2569 = vmatmul.mubr.msk.f32.vlgmr.msra.gmra.mrb[0].mxu0 %vm976_vm1, %v677_v8 }
 0x2e7   : > { %2679 = vmatpush3.bf16.xpose.msk.msra.mxu1 %vm3188_vm2, %v2674_v16  ;;  %2575 = vmatprep.mubr.msk.f32.mxu1 %vm976_vm1, %v610_v14 }
 0x2e8   : > { %2685 = vmatpush3.bf16.xpose.msk.msra.mxu0 %vm3188_vm2, %v2680_v17  ;;  %2582 = vmatprep.mubr.msk.f32.mxu0 %vm976_vm1, %v611_v15 }
 0x2ee   : > { %2576 = vmatmul.mubr.msk.f32.vlgmr.msra.gmra.mrb[4].mxu1 %vm976_vm1, %v678_v9 }
 0x2ef   : > { %2583 = vmatmul.mubr.msk.f32.vlgmr.msra.gmra.mrb[2].mxu0 %vm976_vm1, %v679_v10 }
 0x3b9   : > { %v2563_v18 = vpop.f32.mrb[2].mxu1  ;;  %v2570_v19 = vpop.f32.mrb[0].mxu0 }
 0x3ba   : > { %v1049_v20 = vpop.f32.mrb[3].mxu1  ;;  %v1130_v21 = vpop.f32.mrb[1].mxu0  ;;  %v1311_v22 = vsel %vm1301_vm3, %v2570_v19, -inf  ;;  %v1305_v23 = vsel %vm1301_vm3, %v2563_v18, -inf }
 0x3bb   : > { %1312 = vmax.xlane.f32.xlu0 %v1311_v22  ;;  %1306 = vmax.xlane.f32.xlu1 %v1305_v23  ;;  %v1302_v24 = vsel %vm1301_vm3, %v1049_v20, -inf  ;;  %v1308_v28 = vsel %vm1301_vm3, %v1130_v21, -inf }
 0x3bf   : > { %1303 = vmax.xlane.f32.xlu0 %v1302_v24 }
 0x3c1   : > { %v2577_v25 = vpop.f32.mrb[4].mxu1 }
 0x3c2   : > { %v2584_v26 = vpop.f32.mrb[2].mxu0  ;;  %v1211_v27 = vpop.f32.mrb[5].mxu1  ;;  %v1317_v35 = vsel %vm1301_vm3, %v2577_v25, -inf }
 0x3c3   : > { %v1292_v29 = vpop.f32.mrb[3].mxu0  ;;  %1309 = vmax.xlane.f32.xlu0 %v1308_v28  ;;  %v1314_v32 = vsel %vm1301_vm3, %v1211_v27, -inf  ;;  %v1323_v34 = vsel %vm1301_vm3, %v2584_v26, -inf }
 0x3c4   : > { %v1320_v30 = vsel %vm1301_vm3, %v1292_v29, -inf }
 0x3c5   : > { %1321 = vmax.xlane.f32.xlu1 %v1320_v30 }
 0x3c7   : > { %1315 = vmax.xlane.f32.xlu0 %v1314_v32 }
 0x3c9   : > { %1324 = vmax.xlane.f32.xlu1 %v1323_v34 }
 0x3cb   : > { %1318 = vmax.xlane.f32.xlu0 %v1317_v35 }
 0x3da   : > { %682 = vrot.lane.b32.xlu1 %v3108_v36, %s2945_s15 }
 0x3de   : > { %684 = vrot.lane.b32.xlu1 %v3120_v42, %s2945_s15 }
 0x3e1   : > { %680 = vrot.lane.b32.xlu0 %v3110_v38, %s2945_s15 }
 0x3e2   : > { %686 = vrot.lane.b32.xlu1 %v3118_v41, %s2945_s15 }
 0x3e5   : > { %688 = vrot.lane.b32.xlu0 %v3133_v52, %s2945_s15 }
 0x3e6   : > { %690 = vrot.lane.b32.xlu1 %v3122_v46, %s2945_s15 }
 0x3e9   : > { %692 = vrot.lane.b32.xlu0 %v3124_v47, %s2945_s15 }
 0x3ea   : > { %694 = vrot.lane.b32.xlu1 %v3150_v62, %s2945_s15 }
 0x448   : > { %v1313_v37 = vpop.xlane.xlu0 %1312  ;;  %v1307_v39 = vpop.xlane.xlu1 %1306 }
 0x449   : > { %v1329_v40 = vsub.f32 %v2570_v19, %v1313_v37  ;;  %v1327_v43 = vsub.f32 %v2563_v18, %v1307_v39 }
 0x44b   : > { %v1336_v44 = vmul.f32 1.442695, %v1327_v43  ;;  %v1340_v36 = vmul.f32 1.442695, %v1329_v40 }
 0x44c   : > { %v1304_v45 = vpop.xlane.xlu0 %1303 }
 0x44d   : > { %v1326_v42 = vsub.f32 %v1049_v20, %v1304_v45  ;;  %2800 = vpow2.f32 %v1336_v44 }
 0x44e   : > { %2802 = vpow2.f32 %v1340_v36 }
 0x44f   : > { %v1334_v38 = vmul.f32 1.442695, %v1326_v42 }
 0x450   : > { %v1310_v41 = vpop.xlane.xlu0 %1309 }
 0x451   : > { %2804 = vpow2.f32 %v1334_v38  ;;  %v1328_v52 = vsub.f32 %v1130_v21, %v1310_v41 }
 0x452   : > { %v1322_v48 = vpop.xlane.xlu1 %1321 }
 0x453   : > { %v1338_v46 = vmul.f32 1.442695, %v1328_v52  ;;  %v1332_v50 = vsub.f32 %v1292_v29, %v1322_v48 }
 0x454   : > { %v1316_v47 = vpop.xlane.xlu0 %1315 }
 0x455   : > { %2806 = vpow2.f32 %v1338_v46  ;;  %v1330_v62 = vsub.f32 %v1211_v27, %v1316_v47  ;;  %v1346_v51 = vmul.f32 1.442695, %v1332_v50 }
 0x456   : > { %v1325_v53 = vpop.xlane.xlu1 %1324 }
 0x457   : > { %v1342_v54 = vmul.f32 1.442695, %v1330_v62  ;;  %v1333_v56 = vsub.f32 %v2584_v26, %v1325_v53  ;;  %v3230_v57 = vpop.eup %2800 }
 0x458   : > { %v1319_v58 = vpop.xlane.xlu0 %1318  ;;  %v1353_v61 = vsel %vm1301_vm3, %v3230_v57, 0.0  ;;  %v3234_v63 = vpop.eup %2802 }
 0x459   : > { %2808 = vpow2.f32 %v1342_v54  ;;  %v1348_v59 = vmul.f32 1.442695, %v1333_v56  ;;  %v1331_v60 = vsub.f32 %v2577_v25, %v1319_v58  ;;  %1354 = vadd.xlane.f32.xlu1 %v1353_v61  ;;  %v1359_v7 = vsel %vm1301_vm3, %v3234_v63, 0.0 }
 0x45a   : > { %2810 = vpow2.f32 %v1346_v51  ;;  %v683_v2 = vpop.permute.xlu1 %682 }
 0x45b   : > { %v3236_v3 = vpop.eup %2804  ;;  %2812 = vpow2.f32 %v1348_v59  ;;  %v1344_v4 = vmul.f32 1.442695, %v1331_v60 }
 0x45c   : > { %v681_v5 = vpop.permute.xlu0 %680  ;;  %v1350_v6 = vsel %vm1301_vm3, %v3236_v3, 0.0 }
 0x45d   : > { %1351 = vadd.xlane.f32.xlu0 %v1350_v6  ;;  %1360 = vadd.xlane.f32.xlu1 %v1359_v7  ;;  %2814 = vpow2.f32 %v1344_v4 }
 0x45e   : > { %v685_v8 = vpop.permute.xlu1 %684 }
 0x45f   : > { %v3242_v9 = vpop.eup %2806 }
 0x460   : > { %v689_v10 = vpop.permute.xlu0 %688  ;;  %v1356_v11 = vsel %vm1301_vm3, %v3242_v9, 0.0 }
 0x461   : > { %1357 = vadd.xlane.f32.xlu0 %v1356_v11  ;;  %v704_v14 = vcombine.low %v681_v5, %v689_v10  ;;  %v705_v15 = vcombine.high %v681_v5, %v689_v10 }
 0x462   : > { %v687_v12 = vpop.permute.xlu1 %686 }
 0x463   : > { %v3246_v13 = vpop.eup %2808  ;;  %v712_v24 = vrot.slane %v704_v14, %v3127_v49  ;;  %v719_v25 = vrot.slane %v705_v15, %v3127_v49 }
 0x464   : > { %v3248_v16 = vpop.eup %2810  ;;  %v693_v17 = vpop.permute.xlu0 %692  ;;  %v1362_v18 = vsel %vm1301_vm3, %v3246_v13, 0.0 }
 0x465   : > { %v3252_v19 = vpop.eup %2812  ;;  %v720_v20 = vcombine.low %v685_v8, %v693_v17  ;;  %v721_v21 = vcombine.high %v685_v8, %v693_v17  ;;  %1363 = vadd.xlane.f32.xlu0 %v1362_v18  ;;  %v1368_v28 = vsel %vm1301_vm3, %v3248_v16, 0.0 }
 0x466   : > { %v691_v22 = vpop.permute.xlu1 %690  ;;  %v1371_v23 = vsel %vm1301_vm3, %v3252_v19, 0.0 }
 0x467   : > { %v728_v26 = vrot.slane %v720_v20, %v3127_v49  ;;  %v735_v27 = vrot.slane %v721_v21, %v3127_v49  ;;  %1372 = vadd.xlane.f32.xlu1 %v1371_v23  ;;  %v3262_v29 = vpop.eup %2814  ;;  %v772_v37 = vcombine.low %v683_v2, %v691_v22  ;;  %v773_v39 = vcombine.high %v683_v2, %v691_v22 }
 0x468   : > { %v1365_v41 = vsel %vm1301_vm3, %v3262_v29, 0.0 }
 0x469   : > { %v736_v30 = vcombine.low %v712_v24, %v728_v26  ;;  %v737_v32 = vcombine.high %v712_v24, %v728_v26  ;;  %v752_v34 = vcombine.low %v719_v25, %v735_v27  ;;  %v753_v35 = vcombine.high %v719_v25, %v735_v27  ;;  %1369 = vadd.xlane.f32.xlu0 %v1368_v28 }
 0x46a   : > { %v695_v40 = vpop.permute.xlu1 %694  ;;  %v780_v47 = vrot.slane %v772_v37, %v3127_v49  ;;  %v787_v62 = vrot.slane %v773_v39, %v3127_v49 }
 0x46b   : > { %v744_v43 = vrot.slane %v736_v30, %v3140_v55  ;;  %v751_v44 = vrot.slane %v737_v32, %v3140_v55  ;;  %v760_v36 = vrot.slane %v752_v34, %v3140_v55  ;;  %v767_v45 = vrot.slane %v753_v35, %v3140_v55 }
 0x46c   : > { %v788_v42 = vcombine.low %v687_v12, %v695_v40  ;;  %v789_v38 = vcombine.high %v687_v12, %v695_v40 }
 0x46d   : > { %v840_v52 = vcombine.low %v744_v43, %v751_v44  ;;  %v2442_v48 = vcombine.high %v744_v43, %v751_v44  ;;  %v856_v46 = vcombine.low %v760_v36, %v767_v45  ;;  %v2443_v50 = vcombine.high %v760_v36, %v767_v45  ;;  %1366 = vadd.xlane.f32.xlu0 %v1365_v41 }
 0x46e   : > { %v796_v51 = vrot.slane %v788_v42, %v3127_v49  ;;  %v803_v53 = vrot.slane %v789_v38, %v3127_v49 }
 0x46f   : > { %v847_v54 = vrot.slane %v840_v52, %v3127_v49  ;;  %v855_v56 = vrot.slane %v2442_v48, %v3127_v49  ;;  %v863_v58 = vrot.slane %v856_v46, %v3127_v49  ;;  %v871_v59 = vrot.slane %v2443_v50, %v3127_v49 }
 0x470   : > { %v804_v60 = vcombine.low %v780_v47, %v796_v51  ;;  %v805_v61 = vcombine.high %v780_v47, %v796_v51  ;;  %v820_v2 = vcombine.low %v787_v62, %v803_v53  ;;  %v821_v4 = vcombine.high %v787_v62, %v803_v53 }
 0x471   : > { %v873_v5 = vcombine.high %v847_v54, %v855_v56  ;;  %v889_v6 = vcombine.high %v863_v58, %v871_v59  ;;  %v872_v12 = vcombine.low %v847_v54, %v855_v56  ;;  %v888_v14 = vcombine.low %v863_v58, %v871_v59 }
 0x472   : > { %v812_v7 = vrot.slane %v804_v60, %v3140_v55  ;;  %v819_v8 = vrot.slane %v805_v61, %v3140_v55  ;;  %v828_v10 = vrot.slane %v820_v2, %v3140_v55  ;;  %v835_v11 = vrot.slane %v821_v4, %v3140_v55 }
 0x473   : > { %v887_v15 = vrot.slane %v873_v5, %v3140_v55  ;;  %v903_v17 = vrot.slane %v889_v6, %v3140_v55  ;;  %v880_v28 = vrot.slane %v872_v12, %v3140_v55  ;;  %v896_v30 = vrot.slane %v888_v14, %v3140_v55 }
 0x474   : > { %v908_v18 = vcombine.low %v812_v7, %v819_v8  ;;  %v2444_v20 = vcombine.high %v812_v7, %v819_v8  ;;  %v924_v21 = vcombine.low %v828_v10, %v835_v11  ;;  %v2445_v22 = vcombine.high %v828_v10, %v835_v11 }
 0x475   : > { %v907_v23 = vcombine.high %v887_v15, %v903_v17  ;;  %v904_v36 = vcombine.low %v880_v28, %v896_v30  ;;  %v906_v45 = vcombine.low %v887_v15, %v903_v17  ;;  %v905_v50 = vcombine.high %v880_v28, %v896_v30 }
 0x476   : > { %v915_v24 = vrot.slane %v908_v18, %v3127_v49  ;;  %v923_v25 = vrot.slane %v2444_v20, %v3127_v49  ;;  %v931_v26 = vrot.slane %v924_v21, %v3127_v49  ;;  %v939_v27 = vrot.slane %v2445_v22, %v3127_v49 }
 0x478   : > { %v940_v32 = vcombine.low %v915_v24, %v923_v25  ;;  %v956_v34 = vcombine.low %v931_v26, %v939_v27  ;;  %v941_v35 = vcombine.high %v915_v24, %v923_v25  ;;  %v957_v37 = vcombine.high %v931_v26, %v939_v27 }
 0x47a   : > { %v948_v39 = vrot.slane %v940_v32, %v3140_v55  ;;  %v964_v40 = vrot.slane %v956_v34, %v3140_v55  ;;  %v955_v43 = vrot.slane %v941_v35, %v3140_v55  ;;  %v971_v44 = vrot.slane %v957_v37, %v3140_v55 }
 0x47c   : > { %v972_v42 = vcombine.low %v948_v39, %v964_v40  ;;  %v974_v38 = vcombine.low %v955_v43, %v971_v44  ;;  %v973_v41 = vcombine.high %v948_v39, %v964_v40  ;;  %v975_v52 = vcombine.high %v955_v43, %v971_v44 }
 0x47e   : > { %v2686_v48 = vpack.c.bf16 %v972_v42, %v904_v36  ;;  %v2694_v46 = vpack.c.bf16 %v974_v38, %v906_v45  ;;  %v2698_v47 = vpack.c.bf16 %v975_v52, %v907_v23  ;;  %v2690_v62 = vpack.c.bf16 %v973_v41, %v905_v50 }
 0x480   : > { %2687 = vmatprep.subr.bf16.mxu1 %v2686_v48  ;;  %2695 = vmatprep.subr.bf16.mxu0 %v2694_v46 }
 0x481   : > { %2689 = vmatpush3.bf16.msra.mxu1 %v2686_v48  ;;  %2697 = vmatpush3.bf16.msra.mxu0 %v2694_v46 }
 0x482   : > { %2691 = vmatprep.subr.bf16.mxu1 %v2690_v62 }
 0x4e6   : > { %v1355_v51 = vpop.xlane.xlu1 %1354 }
 0x4e7   : > { %2816 = vrcp.f32 %v1355_v51 }
 0x4ea   : > { %v1352_v53 = vpop.xlane.xlu0 %1351  ;;  %v1361_v54 = vpop.xlane.xlu1 %1360 }
 0x4eb   : > { %2818 = vrcp.f32 %v1352_v53 }
 0x4ec   : > { %2820 = vrcp.f32 %v1361_v54 }
 0x4ee   : > { %v1358_v56 = vpop.xlane.xlu0 %1357 }
 0x4ef   : > { %2822 = vrcp.f32 %v1358_v56 }
 0x4f1   : > { %v2817_v59 = vpop.eup %2816 }
 0x4f2   : > { %v1364_v58 = vpop.xlane.xlu0 %1363  ;;  %v1383_v5 = vmul.f32 %v2817_v59, %v3230_v57 }
 0x4f3   : > { %2824 = vrcp.f32 %v1364_v58 }
 0x4f4   : > { %v1373_v60 = vpop.xlane.xlu1 %1372 }
 0x4f5   : > { %v2819_v61 = vpop.eup %2818  ;;  %2826 = vrcp.f32 %v1373_v60 }
 0x4f6   : > { %v1370_v2 = vpop.xlane.xlu0 %1369  ;;  %v1382_v4 = vmul.f32 %v2819_v61, %v3236_v3  ;;  %v2821_v6 = vpop.eup %2820 }
 0x4f7   : > { %2828 = vrcp.f32 %v1370_v2  ;;  %v1385_v11 = vmul.f32 %v2821_v6, %v3234_v63 }
 0x4f8   : > { %2589 = vmatprep.mubr.msk.f32.mxu1 %vm1301_vm3, %v1382_v4 }
 0x4f9   : > { %v2823_v7 = vpop.eup %2822  ;;  %2590 = vmatmul.mubr.msk.f32.vlgmr.msra.gmra.mrb[6].mxu1 %vm1301_vm3, %v1383_v5 }
 0x4fa   : > { %2693 = vmatpush3.bf16.msra.mxu1 %v2690_v62  ;;  %v1367_v8 = vpop.xlane.xlu0 %1366  ;;  %v1384_v10 = vmul.f32 %v2823_v7, %v3242_v9 }
 0x4fb   : > { %2699 = vmatprep.subr.bf16.mxu1 %v2698_v47  ;;  %2830 = vrcp.f32 %v1367_v8 }
 0x4fc   : > { %2596 = vmatprep.mubr.msk.f32.mxu1 %vm1301_vm3, %v1384_v10 }
 0x4fd   : > { %v2825_v3 = vpop.eup %2824  ;;  %2597 = vmatmul.mubr.msk.f32.vlgmr.msra.gmra.mrb[8].mxu1 %vm1301_vm3, %v1385_v11 }
 0x4fe   : > { %2701 = vmatpush3.bf16.msra.mxu1 %v2698_v47  ;;  %v1386_v57 = vmul.f32 %v2825_v3, %v3246_v13 }
 0x4ff   : > { %v2827_v12 = vpop.eup %2826 }
 0x500   : > { %2603 = vmatprep.mubr.msk.f32.mxu0 %vm1301_vm3, %v1386_v57  ;;  %v1389_v9 = vmul.f32 %v2827_v12, %v3252_v19 }
 0x501   : > { %v2829_v14 = vpop.eup %2828 }
 0x502   : > { %v1388_v15 = vmul.f32 %v2829_v14, %v3248_v16 }
 0x504   : > { %2610 = vmatprep.mubr.msk.f32.mxu1 %vm1301_vm3, %v1388_v15 }
 0x505   : > { %v2831_v63 = vpop.eup %2830  ;;  %2611 = vmatmul.mubr.msk.f32.vlgmr.msra.gmra.mrb[10].mxu1 %vm1301_vm3, %v1389_v9 }
 0x506   : > { %v1387_v17 = vmul.f32 %v2831_v63, %v3262_v29 }
 0x508   : > { %2604 = vmatmul.mubr.msk.f32.vlgmr.msra.gmra.mrb[4].mxu0 %vm1301_vm3, %v1387_v17 }
 0x5cc   : > { %v2591_v18 = vpop.f32.mrb[6].mxu1 }
 0x5cd   : > { %v1462_v20 = vpop.f32.mrb[7].mxu1 }
 0x5d0   : > { %v2598_v13 = vpop.f32.mrb[8].mxu1 }
 0x5d1   : > { %v1543_v21 = vpop.f32.mrb[9].mxu1 }
 0x5d8   : > { %v2612_v22 = vpop.f32.mrb[10].mxu1 }
 0x5d9   : > { %v1798_v23 = vcombine.low %v2598_v13, %v2612_v22  ;;  %v1799_v24 = vcombine.high %v2598_v13, %v2612_v22  ;;  %v1705_v25 = vpop.f32.mrb[11].mxu1 }
 0x5da   : > { %v1730_v16 = vcombine.low %v1543_v21, %v1705_v25  ;;  %v1731_v26 = vcombine.high %v1543_v21, %v1705_v25 }
 0x5db   : > { %v2605_v19 = vpop.f32.mrb[4].mxu0  ;;  %v1806_v29 = vrot.slane %v1798_v23, %v3127_v49  ;;  %v1813_v35 = vrot.slane %v1799_v24, %v3127_v49 }
 0x5dc   : > { %v1782_v27 = vcombine.low %v2591_v18, %v2605_v19  ;;  %v1783_v28 = vcombine.high %v2591_v18, %v2605_v19  ;;  %v1624_v30 = vpop.f32.mrb[5].mxu0  ;;  %v1738_v40 = vrot.slane %v1730_v16, %v3127_v49  ;;  %v1745_v43 = vrot.slane %v1731_v26, %v3127_v49 }
 0x5dd   : > { %v1714_v32 = vcombine.low %v1462_v20, %v1624_v30  ;;  %v1715_v34 = vcombine.high %v1462_v20, %v1624_v30 }
 0x5de   : > { %v1790_v37 = vrot.slane %v1782_v27, %v3127_v49  ;;  %v1797_v39 = vrot.slane %v1783_v28, %v3127_v49 }
 0x5df   : > { %v1722_v44 = vrot.slane %v1714_v32, %v3127_v49  ;;  %v1729_v36 = vrot.slane %v1715_v34, %v3127_v49  ;;  %v2018_v32 = vld [vmem:[%s3466_s2 + $0x8] sm:$0xff]  ;;  %v2019_v34 = vld [vmem:[%s3466_s2 + $0x10] sm:$0xff] }
 0x5e0   : > { %v1814_v45 = vcombine.low %v1790_v37, %v1806_v29  ;;  %v1815_v42 = vcombine.high %v1790_v37, %v1806_v29  ;;  %v1830_v38 = vcombine.low %v1797_v39, %v1813_v35  ;;  %v1831_v41 = vcombine.high %v1797_v39, %v1813_v35  ;;  %v2020_v29 = vld [vmem:[%s3466_s2 + $0x18] sm:$0xff] }
 0x5e1   : > { %v1746_v52 = vcombine.low %v1722_v44, %v1738_v40  ;;  %v1747_v48 = vcombine.high %v1722_v44, %v1738_v40  ;;  %v1762_v46 = vcombine.low %v1729_v36, %v1745_v43  ;;  %v1763_v50 = vcombine.high %v1729_v36, %v1745_v43 }
 0x5e2   : > { %v1822_v47 = vrot.slane %v1814_v45, %v3140_v55  ;;  %v1829_v62 = vrot.slane %v1815_v42, %v3140_v55  ;;  %v1838_v51 = vrot.slane %v1830_v38, %v3140_v55  ;;  %v1845_v53 = vrot.slane %v1831_v41, %v3140_v55 }
 0x5e3   : > { %v1754_v54 = vrot.slane %v1746_v52, %v3140_v55  ;;  %v1761_v56 = vrot.slane %v1747_v48, %v3140_v55  ;;  %v1770_v58 = vrot.slane %v1762_v46, %v3140_v55  ;;  %v1777_v59 = vrot.slane %v1763_v50, %v3140_v55 }
 0x5e4   : > { %v1918_v60 = vcombine.low %v1822_v47, %v1829_v62  ;;  %v2472_v61 = vcombine.high %v1822_v47, %v1829_v62  ;;  %v1934_v2 = vcombine.low %v1838_v51, %v1845_v53  ;;  %v2473_v4 = vcombine.high %v1838_v51, %v1845_v53 }
 0x5e5   : > { %v1850_v5 = vcombine.low %v1754_v54, %v1761_v56  ;;  %v2470_v6 = vcombine.high %v1754_v54, %v1761_v56  ;;  %v1866_v7 = vcombine.low %v1770_v58, %v1777_v59  ;;  %v2471_v8 = vcombine.high %v1770_v58, %v1777_v59 }
 0x5e6   : > { %v1925_v10 = vrot.slane %v1918_v60, %v3127_v49  ;;  %v1933_v11 = vrot.slane %v2472_v61, %v3127_v49  ;;  %v1941_v3 = vrot.slane %v1934_v2, %v3127_v49  ;;  %v1949_v57 = vrot.slane %v2473_v4, %v3127_v49 }
 0x5e7   : > { %v1857_v12 = vrot.slane %v1850_v5, %v3127_v49  ;;  %v1865_v14 = vrot.slane %v2470_v6, %v3127_v49  ;;  %v1873_v15 = vrot.slane %v1866_v7, %v3127_v49  ;;  %v1881_v9 = vrot.slane %v2471_v8, %v3127_v49  ;;  %v2017_v49 = vld [vmem:[%s3466_s2] sm:$0xff] }
 0x5e8   : > { %v1950_v63 = vcombine.low %v1925_v10, %v1933_v11  ;;  %v1966_v17 = vcombine.low %v1941_v3, %v1949_v57  ;;  %v1951_v18 = vcombine.high %v1925_v10, %v1933_v11  ;;  %v1967_v20 = vcombine.high %v1941_v3, %v1949_v57 }
 0x5e9   : > { %v1882_v13 = vcombine.low %v1857_v12, %v1865_v14  ;;  %v1898_v21 = vcombine.low %v1873_v15, %v1881_v9  ;;  %v1883_v22 = vcombine.high %v1857_v12, %v1865_v14  ;;  %v1899_v23 = vcombine.high %v1873_v15, %v1881_v9  ;;  %v2134_v9 = vld [vmem:[#allocation2] sm:$0xff] }
 0x5ea   : > { %v1958_v24 = vrot.slane %v1950_v63, %v3140_v55  ;;  %v1974_v25 = vrot.slane %v1966_v17, %v3140_v55  ;;  %v1965_v16 = vrot.slane %v1951_v18, %v3140_v55  ;;  %v1981_v26 = vrot.slane %v1967_v20, %v3140_v55  ;;  %v2135_v63 = vld [vmem:[#allocation2 + $0x8] sm:$0xff]  ;;  %v2136_v18 = vld [vmem:[#allocation2 + $0x10] sm:$0xff]  ;;  %v2137_v20 = vld [vmem:[#allocation2 + $0x18] sm:$0xff] }
 0x5eb   : > { %v1890_v19 = vrot.slane %v1882_v13, %v3140_v55  ;;  %v1906_v27 = vrot.slane %v1898_v21, %v3140_v55  ;;  %v1897_v28 = vrot.slane %v1883_v22, %v3140_v55  ;;  %v1913_v30 = vrot.slane %v1899_v23, %v3140_v55 }
 0x5ec   : > { %v1983_v35 = vcombine.high %v1958_v24, %v1974_v25  ;;  %v1984_v37 = vcombine.low %v1965_v16, %v1981_v26  ;;  %v1985_v39 = vcombine.high %v1965_v16, %v1981_v26  ;;  %v1982_v40 = vcombine.low %v1958_v24, %v1974_v25 }
 0x5ed   : > { %v1915_v43 = vcombine.high %v1890_v19, %v1906_v27  ;;  %v1917_v44 = vcombine.high %v1897_v28, %v1913_v30  ;;  %v1916_v36 = vcombine.low %v1897_v28, %v1913_v30  ;;  %v1914_v55 = vcombine.low %v1890_v19, %v1906_v27  ;;  %v2241_v28 = vld [vmem:[%s3468_s4] sm:$0xff]  ;;  %v2242_v30 = vld [vmem:[%s3468_s4 + $0x8] sm:$0xff] }
 0x5ee   : > { %1990 = vrot.lane.b32.xlu1 %v1983_v35, %s2946_s28  ;;  %v2702_v45 = vpack.c.bf16 %v2018_v32, %v2017_v49  ;;  %v2706_v42 = vpack.c.bf16 %v2020_v29, %v2019_v34  ;;  %v2023_v58 = vsub.s32 2, %v3099_v31  ;;  %v2710_v17 = vpack.c.bf16 %v2135_v63, %v2134_v9  ;;  %v2243_v32 = vld [vmem:[%s3468_s4 + $0x10] sm:$0xff]  ;;  %v2244_v29 = vld [vmem:[%s3468_s4 + $0x18] sm:$0xff] }
 0x5ef   : > { %1988 = vrot.lane.b32.xlu0 %v1915_v43, %s2946_s28  ;;  %v2714_v13 = vpack.c.bf16 %v2137_v20, %v2136_v18  ;;  %v2718_v34 = vpack.c.bf16 %v2242_v30, %v2241_v28  ;;  %v2722_v35 = vpack.c.bf16 %v2244_v29, %v2243_v32  ;;  %v2247_v43 = vld [vmem:[%s3468_s4 + $0x30] sm:$0xff] }
 0x5f0   : > { %2703 = vmatprep.subr.bf16.mxu0 %v2702_v45  ;;  %v2024_v59 = vrot.slane %v3105_v33, %v2023_v58  ;;  %2711 = vmatprep.subr.bf16.mxu1 %v2710_v17 }
 0x5f1   : > { %2705 = vmatpush3.bf16.msra.mxu0 %v2702_v45  ;;  %2713 = vmatpush3.bf16.msra.mxu1 %v2710_v17  ;;  %v2840_v45 = vld [vmem:[%s3469_s5] sm:$0xf] }
 0x5f2   : > { %1998 = vrot.lane.b32.xlu1 %v1984_v37, %s2947_s29  ;;  %2707 = vmatprep.subr.bf16.mxu0 %v2706_v42  ;;  %v2245_v37 = vld [vmem:[%s3468_s4 + $0x20] sm:$0xff] }
 0x5f3   : > { %2004 = vrot.lane.b32.xlu0 %v1917_v44, %s2948_s10  ;;  %2715 = vmatprep.subr.bf16.mxu1 %v2714_v13  ;;  %v2248_v44 = vld [vmem:[%s3468_s4 + $0x38] sm:$0xff] }
 0x5f5   : > { %2709 = vmatpush3.bf16.msra.mxu0 %v2706_v42  ;;  %2717 = vmatpush3.bf16.msra.mxu1 %v2714_v13 }
 0x5f6   : > { %1996 = vrot.lane.b32.xlu1 %v1916_v36, %s2947_s29  ;;  %2719 = vmatprep.subr.bf16.mxu0 %v2718_v34  ;;  %v2730_v36 = vpack.c.bf16 %v2248_v44, %v2247_v43  ;;  %s2869_s29 = scalar_lea.vmem %s3418_s18, 256 }
 0x5f7   : > { %p2870_p6 = scmp.ne.s32.totalorder %s3418_s18, %s2869_s29 }
 0x5f9   : > { %p2871_p10 = pnand %p2870_p6, %p3483_p9 }
 0x5fa   : > { %2006 = vrot.lane.b32.xlu1 %v1985_v39, %s2948_s10  ;;  %v2246_v39 = vld [vmem:[%s3468_s4 + $0x28] sm:$0xff]  ;;  %s2949_s10 = smov [#allocation5]  }
 0x5fb   : > { %p2872_p12 = pneg %p2871_p10  ;;  %s2873_s13 = sshll.u32 %s2949_s10, 4  ;;  %s2874_s13 = int_to_ptr.vmem [resolvable:$false] %s2873_s13 }
 0x5fc   : > { %s2875_s14 = scalar_lea.vmem %s2874_s13, 512  ;;  %p2876_p2 = scmp.lt.s32.totalorder %s3418_s18, %s2874_s13 }
 0x5fd   : > { %p2877_p3 = scmp.lt.s32.totalorder %s2875_s14, %s2869_s29 }
 0x5ff   : > { %p2878_p4 = por %p2877_p3, %p2876_p2 }
 0x601   : > { %p2879_p7 = pnand %p2878_p4, %p2872_p12 }
 0x660   : > { %v1991_v38 = vpop.permute.xlu1 %1990 }
 0x661   : > { %v1989_v41 = vpop.permute.xlu0 %1988  ;;  %v2011_v51 = vsel %vm976_vm1, %v1982_v40, %v1991_v38  ;;  %v2726_v40 = vpack.c.bf16 %v2246_v39, %v2245_v37 }
 0x662   : > { %v2010_v48 = vsel %vm976_vm1, %v1914_v55, %v1989_v41  ;;  %v2140_v55 = vsub.s32 1, %v3099_v31 }
 0x664   : > { %v1999_v52 = vpop.permute.xlu1 %1998  ;;  %v2141_v42 = vrot.slane %v2840_v45, %v2140_v55 }
 0x665   : > { %v2005_v50 = vpop.permute.xlu0 %2004  ;;  %v2013_v53 = vsel %vm1301_vm3, %v2011_v51, %v1999_v52 }
 0x668   : > { %v1997_v46 = vpop.permute.xlu1 %1996 }
 0x669   : > { %v2012_v47 = vsel %vm1301_vm3, %v2010_v48, %v1997_v46 }
 0x66a   : > { %v2015_v62 = vsel %vm2014_vm4, %v2012_v47, %v2005_v50 }
 0x66b   : > { %2621 = vmatprep.mubr.msk.f32.mxu0 %vm271_vm0, %v2015_v62 }
 0x66c   : > { %v2007_v54 = vpop.permute.xlu1 %2006 }
 0x66d   : > { %v2016_v56 = vsel %vm2014_vm4, %v2013_v53, %v2007_v54 }
 0x66e   : > { %2622 = vmatmul.mubr.msk.f32.vlgmr.msra.gmra.mrb[6].mxu0 %vm271_vm0, %v2016_v56 }
 0x66f   : > { %2721 = vmatpush3.bf16.msra.mxu0 %v2718_v34 }
 0x670   : > { %2723 = vmatprep.subr.bf16.mxu0 %v2722_v35 }
 0x673   : > { %2725 = vmatpush3.bf16.msra.mxu0 %v2722_v35 }
 0x674   : > { %2727 = vmatprep.subr.bf16.mxu0 %v2726_v40 }
 0x677   : > { %2729 = vmatpush3.bf16.msra.mxu0 %v2726_v40 }
 0x678   : > { %2731 = vmatprep.subr.bf16.mxu0 %v2730_v36 }
 0x67b   : > { %2733 = vmatpush3.bf16.msra.mxu0 %v2730_v36 }
 0x741   : > { %v2623_v60 = vpop.f32.mrb[6].mxu0 }
 0x742   : > { %v2103_v61 = vadd.f32 %v2623_v60, %v2024_v59  ;;  %v2097_v2 = vpop.f32.mrb[7].mxu0 }
 0x743   : > { %v2098_v4 = vadd.f32 %v2097_v2, %v2024_v59 }
 0x744   : > { %v3365_v5 = vadd.f32 %v2103_v61, %v3075_v1 }
 0x745   : > { %v3368_v6 = vadd.f32 %v2098_v4, %v3073_v0 }
 0x746   : > { %v2111_v7 = vsel %vm271_vm0, %v3365_v5, 0.0 }
 0x747   : > { %2112 = vadd.xlane.f32.xlu1 %v2111_v7  ;;  %v2108_v8 = vsel %vm271_vm0, %v3368_v6, 0.0 }
 0x748   : > { %2109 = vadd.xlane.f32.xlu0 %v2108_v8 }
 0x7d4   : > { %v2113_v10 = vpop.xlane.xlu1 %2112 }
 0x7d5   : > { %v2115_v33 = vmul.f32 0.03125, %v2113_v10  ;;  %v2110_v11 = vpop.xlane.xlu0 %2109 }
 0x7d6   : > { %v2114_v3 = vmul.f32 0.03125, %v2110_v11  ;;  %v2251_v11 = vsub.s32 3, %v3099_v31 }
 0x7d7   : > { %v2117_v57 = vsub.f32 %v3365_v5, %v2115_v33 }
 0x7d8   : > { %v2116_v1 = vsub.f32 %v3368_v6, %v2114_v3  ;;  %v2252_v3 = vrot.slane %v2840_v45, %v2251_v11 }
 0x7d9   : > { %v2119_v14 = vmul.f32 %v2117_v57, %v2117_v57 }
 0x7da   : > { %v2118_v12 = vmul.f32 %v2116_v1, %v2116_v1 }
 0x7db   : > { %v2123_v15 = vsel %vm271_vm0, %v2119_v14, 0.0 }
 0x7dc   : > { %v2120_v0 = vsel %vm271_vm0, %v2118_v12, 0.0 }
 0x7dd   : > { %2121 = vadd.xlane.f32.xlu0 %v2120_v0 }
 0x7e1   : > { %2124 = vadd.xlane.f32.xlu0 %v2123_v15 }
 0x86a   : > { %v2122_v21 = vpop.xlane.xlu0 %2121 }
 0x86b   : > { %v2126_v22 = vmul.f32 0.03125, %v2122_v21 }
 0x86d   : > { %v2128_v23 = vadd.f32 1e-06, %v2126_v22 }
 0x86e   : > { %v2125_v24 = vpop.xlane.xlu0 %2124 }
 0x86f   : > { %2832 = vrsqrt.f32 %v2128_v23  ;;  %v2127_v25 = vmul.f32 0.03125, %v2125_v24 }
 0x871   : > { %v2129_v16 = vadd.f32 1e-06, %v2127_v25 }
 0x873   : > { %2834 = vrsqrt.f32 %v2129_v16 }
 0x879   : > { %v2833_v26 = vpop.eup %2832 }
 0x87a   : > { %v2132_v49 = vmul.f32 %v2833_v26, %v2116_v1 }
 0x87c   : > { %2632 = vmatprep.mubr.msk.f32.mxu1 %vm271_vm0, %v2132_v49 }
 0x87d   : > { %v2835_v19 = vpop.eup %2834 }
 0x87e   : > { %v2133_v27 = vmul.f32 %v2835_v19, %v2117_v57 }
 0x880   : > { %2633 = vmatmul.mubr.msk.f32.vlgmr.msra.gmra.mrb[12].mxu1 %vm271_vm0, %v2133_v27 }
 0x953   : > { %v2634_v38 = vpop.f32.mrb[12].mxu1 }
 0x954   : > { %v2220_v41 = vadd.f32 %v2634_v38, %v2141_v42  ;;  %v2214_v52 = vpop.f32.mrb[13].mxu1 }
 0x955   : > { %v2215_v48 = vadd.f32 %v2214_v52, %v2141_v42 }
 0x956   : > { %v2226_v46 = vmul.f32 0.044715, %v2220_v41  ;;  %v2224_v8 = vmul.f32 0.5, %v2220_v41 }
 0x957   : > { %v2225_v50 = vmul.f32 0.044715, %v2215_v48  ;;  %v2223_v4 = vmul.f32 0.5, %v2215_v48 }
 0x958   : > { %v2228_v47 = vmul.f32 %v2226_v46, %v2220_v41 }
 0x959   : > { %v2227_v62 = vmul.f32 %v2225_v50, %v2215_v48 }
 0x95a   : > { %v2230_v51 = vmul.f32 %v2228_v47, %v2220_v41 }
 0x95b   : > { %v2229_v53 = vmul.f32 %v2227_v62, %v2215_v48 }
 0x95c   : > { %v2232_v54 = vadd.f32 %v2230_v51, %v2220_v41 }
 0x95d   : > { %v2231_v56 = vadd.f32 %v2229_v53, %v2215_v48 }
 0x95e   : > { %v2234_v58 = vmul.f32 0.7978845, %v2232_v54 }
 0x95f   : > { %v2233_v59 = vmul.f32 0.7978845, %v2231_v56 }
 0x960   : > { %2836 = vtanh.f32 %v2234_v58 }
 0x961   : > { %2838 = vtanh.f32 %v2233_v59 }
 0x96a   : > { %v2837_v60 = vpop.eup %2836 }
 0x96b   : > { %v2839_v61 = vpop.eup %2838  ;;  %v2238_v2 = vadd.f32 1.0, %v2837_v60 }
 0x96c   : > { %v2237_v7 = vadd.f32 1.0, %v2839_v61 }
 0x96d   : > { %v2240_v33 = vmul.f32 %v2238_v2, %v2224_v8 }
 0x96e   : > { %v2239_v10 = vmul.f32 %v2237_v7, %v2223_v4 }
 0x970   : > { %2651 = vmatprep.mubr.msk.f32.mxu0 %vm2253_vm5, %v2239_v10 }
 0x971   : > { %2652 = vmatmul.mubr.msk.f32.vlgmr.msra.gmra.mrb[8].mxu0 %vm2253_vm5, %v2240_v33 }
 0xa44   : > { %v2653_v57 = vpop.f32.mrb[8].mxu0 }
 0xa45   : > { %v2332_v1 = vadd.f32 %v2653_v57, %v2252_v3  ;;  %v2326_v12 = vpop.f32.mrb[9].mxu0 }
 0xa46   : > { %v2327_v0 = vadd.f32 %v2326_v12, %v2252_v3 }
 0xa47   : > { %v2336_v14 = vadd.f32 %v2332_v1, %v3365_v5 }
 0xa48   : > { %v2335_v15 = vadd.f32 %v2327_v0, %v3368_v6 }
 0xa49   : > { %2338 = vst.msk [vmem:[%s260_s17 + $0x8] sm:$0xff] %vm271_vm0, %v2336_v14 }
 0xa4a   : > { %2337 = vst.msk [vmem:[%s260_s17] sm:$0xff] %vm271_vm0, %v2335_v15 }
 0xa4b   : > { %2882 = shalt.err (!%p2879_p7)
}
 0xa4c   : > { %s2883_s12 = scalar_lea.hbm %s3415_s26, 256  ;;  %s2887_s9 = scalar_lea.hbm %s3470_s6, 512 }
 0xa4d   : > { %p2884_p8 = scmp.ne.s32.totalorder %s3415_s26, %s2883_s12  ;;  %p2888_p1 = scmp.lt.u32.totalorder %s3415_s26, %s3470_s6 }
 0xa4e   : > { %p2889_p0 = scmp.lt.u32.totalorder %s2887_s9, %s2883_s12  ;;  %p2891_p6 = scmp.lt.u32.totalorder %s2883_s12, %s3415_s26 }
 0xa4f   : > { %p2885_p11 = pnand %p2884_p8, %p3483_p9 }
 0xa50   : > { %p2890_p5 = por %p2889_p0, %p2888_p1 }
 0xa51   : > { %p2886_p13 = pneg %p2885_p11 }
 0xa52   : > { %p2892_p10 = por %p2891_p6, %p2890_p5 }
 0xa54   : > { %p2893_p12 = pnand %p2892_p10, %p2886_p13 }
 0xa56   : > { %2896 = shalt.err (!%p2893_p12)
}
 0xa57   : > { %s2950_s19 = smov 128  }
 0xa58   : > { %2738 = dma.vmem_to_hbm [thread:$0]  (%p3483_p9), %s3418_s18, 256, %s3415_s26, %s3422_s25, %s2950_s19, %s2950_s19, %s2946_s28  }
 0xa59 PF: > { %p2750_p2 = scmp.ge.s32.totalorder %s2935_s24, 2  ;;  %s2368_s20 = sand.u32 1, %s2923_s21  }
 0xa5a   : > { %p3484_p3 = scmp.ne.s32.totalorder %s3475_s8, 0  ;;  %s2369_s29 = scalar_lea.sflag [#allocation4], %s2368_s20 }
 0xa5c   : > { %p2745_p4 = pnand %p2750_p2, %p3484_p3 }
 0xa5e   : > { %2918 = dma.done.wait (!%p2745_p4), %s2369_s29, 256  }
 0xa5f   : > { %2920 = vsyncadd (!%p2745_p4), %s2369_s29, 4294967040  ;;  %p17_p7 = scmp.ge.s32.totalorder %s3011_s27, 4   ;;  %s3485_s21 = smov %s2927_s22 }
 0xa60   : > { %s3486_s22 = smov %s2931_s23  ;;  %s3487_s23 = smov %s3022_s30 }
 0xa61   : > { %s3488_s24 = smov %s3011_s27  ;;  %19 = sbr.rel (!%p17_p7) target bundleno = 4 (0x4), region = 84 }
 0xa68   :  { %2374 = vsyncpa [#allocation3], 1 }
 0xa69   :  { %2376 = vsyncpa [#allocation3 + $0x1], 1 }
 0xa6a   :  { %2377 = vsyncpa [#allocation4], 1 }
 0xa6b   :  { %2379 = vsyncpa [#allocation4 + $0x1], 1 }

</bundles_post_ra>
